<compile_context>
chip_gen: v5e
topology: v5e:2x2
jax: 0.10.0
libtpu: 0.0.40
codegen_flags: <defaults>
</compile_context>

<pallas_src>
import functools

import jax
import jax.numpy as jnp
from jax import lax
from jax.experimental import pallas as pl
from jax.experimental.pallas import tpu as pltpu


RESCALED = 256.0
THRES_MAX = (255.0 - 1.0) / RESCALED
THRES_MIN = 1.0 / RESCALED

_LANE = 128
_MAX_TILE_D = 2048                 # lanes per tile cap
_VMEM_BUDGET = 24 * 1024 * 1024    # working-set budget (fits v7x 64 MiB VMEM)
_VMEM_LIMIT = 32 * 1024 * 1024     # explicit scoped-VMEM limit for Mosaic


def _round_up(v, m):
    return (v + m - 1) // m * m


# ----------------------------- kernels ------------------------------------ #

def _mask_tail_lanes(vals, ki, tile_d, d_total):
    col = ki * tile_d + lax.broadcasted_iota(jnp.int32, vals.shape, 1)
    return jnp.where(col < d_total, vals, 0.0)


def _bernoulli_kernel(x_ref, p_ref, out_ref, acc_ref, *, d_total, tile_d, mask_tail):
    """BCE(recon_p, x) summed over pixels (PyTorch F.binary_cross_entropy,
    with the -100 log clamp)."""
    ki = pl.program_id(1)

    @pl.when(ki == 0)
    def _():
        acc_ref[...] = jnp.zeros_like(acc_ref)

    x = x_ref[...].astype(jnp.float32)
    p = p_ref[...].astype(jnp.float32)
    log_p = jnp.maximum(jnp.log(p), -100.0)
    log_1mp = jnp.maximum(jnp.log(1.0 - p), -100.0)
    bce = -(x * log_p + (1.0 - x) * log_1mp)
    if mask_tail:
        bce = _mask_tail_lanes(bce, ki, tile_d, d_total)
    acc_ref[...] += bce

    @pl.when(ki == pl.num_programs(1) - 1)
    def _():
        out_ref[...] = acc_ref[...].sum(axis=-1, keepdims=True)


def _logistic_kernel(x_ref, r_ref, out_ref, acc_ref, *, d_total, tile_d, mask_tail):
    """Discretized logistic NLL summed over pixels ('logistic' branch).
    r_ref block is (2, tile_b, tile_d): plane 0 = mu, plane 1 = log_s."""
    ki = pl.program_id(1)

    @pl.when(ki == 0)
    def _():
        acc_ref[...] = jnp.zeros_like(acc_ref)

    x = x_ref[...].astype(jnp.float32)
    mu = r_ref[0].astype(jnp.float32)
    logs = r_ref[1].astype(jnp.float32)

    # 1 / clamp(exp(clamp(logs, max=80)), min=1e-7) == min(exp(-min(logs,80)), 1e7)
    inv_s = jnp.minimum(jnp.exp(-jnp.minimum(logs, 80.0)), 1e7)
    xm = x - mu
    cdf_max = jax.nn.sigmoid((xm + 0.5 / RESCALED) * inv_s)
    cdf_min = jax.nn.sigmoid((xm - 0.5 / RESCALED) * inv_s)

    right_edge = (x > THRES_MAX).astype(jnp.float32)
    cdf_max = cdf_max * (1.0 - right_edge) + right_edge
    left_edge = (x < THRES_MIN).astype(jnp.float32)
    cdf_min = cdf_min * (1.0 - left_edge)

    nll = -jnp.log(jnp.maximum(cdf_max - cdf_min, 1e-7))
    if mask_tail:
        nll = _mask_tail_lanes(nll, ki, tile_d, d_total)
    acc_ref[...] += nll

    @pl.when(ki == pl.num_programs(1) - 1)
    def _():
        out_ref[...] = acc_ref[...].sum(axis=-1, keepdims=True)


def _l2_kernel(x_ref, r_ref, out_ref, acc_ref, *, d_total, tile_d, mask_tail):
    """Sum of squared errors over pixels ('l2' branch)."""
    ki = pl.program_id(1)

    @pl.when(ki == 0)
    def _():
        acc_ref[...] = jnp.zeros_like(acc_ref)

    diff = x_ref[...].astype(jnp.float32) - r_ref[...].astype(jnp.float32)
    sq = diff * diff
    if mask_tail:
        sq = _mask_tail_lanes(sq, ki, tile_d, d_total)
    acc_ref[...] += sq

    @pl.when(ki == pl.num_programs(1) - 1)
    def _():
        out_ref[...] = acc_ref[...].sum(axis=-1, keepdims=True)


# --------------------------- pallas wrappers ------------------------------- #

def _tile_sizes(B, D, bytes_per_pixel_col):
    """Pick (tile_b, tile_d): largest lane tile that keeps
    (double-buffered inputs + f32 acc scratch) under the VMEM budget."""
    tile_b = B if B <= 128 else 128
    per_col = tile_b * (2 * bytes_per_pixel_col + 4)       # 2 pipeline bufs + acc
    tile_d = (_VMEM_BUDGET // per_col) // _LANE * _LANE
    tile_d = min(tile_d, _MAX_TILE_D, _round_up(D, _LANE))
    tile_d = max(tile_d, _LANE)
    return tile_b, tile_d


def _launch(kernel, operands, in_specs, B, D, tile_b, tile_d):
    grid = (pl.cdiv(B, tile_b), pl.cdiv(D, tile_d))
    mask_tail = (D % tile_d) != 0
    out = pl.pallas_call(
        functools.partial(kernel, d_total=D, tile_d=tile_d, mask_tail=mask_tail),
        out_shape=jax.ShapeDtypeStruct((B, 1), jnp.float32),
        grid_spec=pltpu.PrefetchScalarGridSpec(
            num_scalar_prefetch=0,
            grid=grid,
            in_specs=in_specs,
            out_specs=pl.BlockSpec((tile_b, 1), lambda bi, ki: (bi, 0)),
            scratch_shapes=[pltpu.VMEM((tile_b, tile_d), jnp.float32)],
        ),
        compiler_params=pltpu.CompilerParams(
            dimension_semantics=("parallel", "arbitrary"),
            vmem_limit_bytes=_VMEM_LIMIT,
        ),
    )(*operands)
    return out[:, 0]  # [B]


class BasePallas:
    """JAX/Pallas port of the `Base` module's numeric surface.

    The abstract methods (forward / sample / vis / cls / test_loss) raise
    NotImplementedError in the PyTorch reference and are not ported.
    """

    def __init__(self, imgd=1, img_size=16, out_dist="logistic"):
        self.imgd = imgd
        self.img_size = img_size
        self.input_dim = img_size * img_size * imgd
        self.out_dist = out_dist
        self.temp_gt_q = 1.0
        # `Base.__init__` defines no learnable parameters; nothing to init.

    def kl_coeff(self, step, num_total_iter):
        total_step = 0.3 * num_total_iter
        constant_step = 0.0001 * num_total_iter
        min_kl_coeff = 0.0001
        self.kl_coeff_v = max(min((step - constant_step) / total_step, 1.0),
                              min_kl_coeff)
        return self.kl_coeff_v

    def compute_recont_loss(self, recon_x, x, B, compute_bpd=True):
        """x: [B, input_dim] in [0,1]; recon_x layout depends on out_dist.
        Returns BCE: [B] (negative log-likelihood summed over pixels)."""
        D = self.input_dim
        x2 = jnp.reshape(x, (B, D))   # no dtype cast: kernels upcast per-tile

        if self.out_dist == "bernoulli":
            p = jnp.reshape(recon_x, (B, D))
            tb, td = _tile_sizes(B, D, x2.dtype.itemsize + p.dtype.itemsize)
            in_specs = [pl.BlockSpec((tb, td), lambda bi, ki: (bi, ki)),
                        pl.BlockSpec((tb, td), lambda bi, ki: (bi, ki))]
            return _launch(_bernoulli_kernel, (x2, p), in_specs, B, D, tb, td)

        if self.out_dist == "l2":
            r = jnp.reshape(recon_x, (B, D))
            tb, td = _tile_sizes(B, D, x2.dtype.itemsize + r.dtype.itemsize)
            in_specs = [pl.BlockSpec((tb, td), lambda bi, ki: (bi, ki)),
                        pl.BlockSpec((tb, td), lambda bi, ki: (bi, ki))]
            return _launch(_l2_kernel, (x2, r), in_specs, B, D, tb, td)

        if self.out_dist == "logistic":
            if recon_x.ndim == 3 and recon_x.shape == (2, B, D):
                # Planar fast path: (mu plane, log_s plane). Zero-copy; the
                # kernel consumes both planes through one (2, tile_b, tile_d)
                # block, so there is no host-side deinterleave pass at all.
                r = recon_x
            else:
                # PyTorch layout: (..., 2) interleaved per pixel. One fused
                # rearrangement to planar (2, B, D); producers that emit
                # (2, B, D) directly skip this HBM pass.
                r = jnp.moveaxis(jnp.reshape(recon_x, (B, D, 2)), -1, 0)
            tb, td = _tile_sizes(B, D, x2.dtype.itemsize + 2 * r.dtype.itemsize)
            in_specs = [pl.BlockSpec((tb, td), lambda bi, ki: (bi, ki)),
                        pl.BlockSpec((2, tb, td), lambda bi, ki: (0, bi, ki))]
            return _launch(_logistic_kernel, (x2, r), in_specs, B, D, tb, td)

        # TODO(synk): 'cat', 'gaussian', 'gaussian_as2svae', 'mixture_logistic'
        # branches depend on erf / Normal-CDF / dmol helpers not ported here.
        raise NotImplementedError(self.out_dist)


# ------------------------------ references --------------------------------- #

def _ref_bernoulli(x, p):
    log_p = jnp.maximum(jnp.log(p), -100.0)
    log_1mp = jnp.maximum(jnp.log(1.0 - p), -100.0)
    return (-(x * log_p + (1.0 - x) * log_1mp)).sum(-1)


def _ref_logistic(x, mu, logs):
    s = jnp.maximum(jnp.exp(jnp.minimum(logs, 80.0)), 1e-7)
    cmax = jax.nn.sigmoid((x + 0.5 / RESCALED - mu) / s)
    cmin = jax.nn.sigmoid((x - 0.5 / RESCALED - mu) / s)
    rmask = (x > THRES_MAX).astype(jnp.float32)
    cmax = cmax * (1 - rmask) + rmask
    lmask = (x < THRES_MIN).astype(jnp.float32)
    cmin = cmin * (1 - lmask)
    return -jnp.log(jnp.maximum(cmax - cmin, 1e-7)).sum(-1)


def _ref_l2(x, r):
    return ((x - r) ** 2).sum(-1)


# --------------------------------- main ------------------------------------ #

if __name__ == "__main__":
    key = jax.random.PRNGKey(0)
    B, imgd, H, W = 2, 1, 16, 16
    D = imgd * H * W

    k1, k2, k3, k4, k5, k6 = jax.random.split(key, 6)
    # x in [0, 1], NCHW like the PyTorch module, flattened to [B, input_dim].
    x_img = jax.random.uniform(k1, (B, imgd, H, W), dtype=jnp.float32)
    x_flat = jnp.reshape(x_img, (B, D))

    # logistic: PyTorch layout [B, D, 2] (mu, log_s interleaved per pixel)
    recon_logistic = jax.random.normal(k2, (B, D, 2), dtype=jnp.float32) * 0.5
    mu, logs = recon_logistic[..., 0], recon_logistic[..., 1]
    # bernoulli: probabilities in (0, 1)
    recon_bern = jax.nn.sigmoid(jax.random.normal(k3, (B, D), dtype=jnp.float32))
    # l2: [B, D]
    recon_l2 = jax.random.uniform(k4, (B, D), dtype=jnp.float32)

    # logistic branch: planar fast path (2, B, D) and PyTorch interleaved layout
    m_log = BasePallas(imgd=imgd, img_size=H, out_dist="logistic")
    ref_log = _ref_logistic(x_flat, mu, logs)
    out_planar = jax.block_until_ready(
        m_log.compute_recont_loss(jnp.stack([mu, logs], axis=0), x_flat, B))
    out_inter = jax.block_until_ready(
        m_log.compute_recont_loss(recon_logistic, x_flat, B))
    assert jnp.allclose(out_planar, ref_log, rtol=1e-5, atol=1e-3), (out_planar, ref_log)
    assert jnp.allclose(out_inter, ref_log, rtol=1e-5, atol=1e-3), (out_inter, ref_log)

    # bernoulli branch
    m_bern = BasePallas(imgd=imgd, img_size=H, out_dist="bernoulli")
    out_bern = jax.block_until_ready(m_bern.compute_recont_loss(recon_bern, x_flat, B))
    ref_bern = _ref_bernoulli(x_flat, recon_bern)
    assert jnp.allclose(out_bern, ref_bern, rtol=1e-5, atol=1e-3), (out_bern, ref_bern)

    # l2 branch (f32)
    m_l2 = BasePallas(imgd=imgd, img_size=H, out_dist="l2")
    out_l2 = jax.block_until_ready(m_l2.compute_recont_loss(recon_l2, x_flat, B))
    ref_l2 = _ref_l2(x_flat, recon_l2)
    assert jnp.allclose(out_l2, ref_l2, rtol=1e-5, atol=1e-3), (out_l2, ref_l2)

    # l2 branch with bf16 inputs streamed as-is (no host-side upcast)
    x_bf = x_flat.astype(jnp.bfloat16)
    r_bf = recon_l2.astype(jnp.bfloat16)
    out_l2_bf = jax.block_until_ready(m_l2.compute_recont_loss(r_bf, x_bf, B))
    ref_l2_bf = _ref_l2(x_bf.astype(jnp.float32), r_bf.astype(jnp.float32))
    assert jnp.allclose(out_l2_bf, ref_l2_bf, rtol=1e-5, atol=1e-3), (out_l2_bf, ref_l2_bf)

    # bernoulli with D not a multiple of 128 -> exercises the tail-mask path
    B2, imgd2, s2 = 2, 3, 10
    D2 = imgd2 * s2 * s2          # 300
    x_tail = jax.random.uniform(k5, (B2, D2), dtype=jnp.float32)
    p_tail = jax.nn.sigmoid(jax.random.normal(k6, (B2, D2), dtype=jnp.float32))
    m_tail = BasePallas(imgd=imgd2, img_size=s2, out_dist="bernoulli")
    out_tail = jax.block_until_ready(m_tail.compute_recont_loss(p_tail, x_tail, B2))
    ref_tail = _ref_bernoulli(x_tail, p_tail)
    assert jnp.allclose(out_tail, ref_tail, rtol=1e-5, atol=1e-3), (out_tail, ref_tail)

    print("KERNEL_OK")
</pallas_src>

<mosaic_0001>
module attributes {stable_mosaic.version = 11 : i64} {
  func.func @_logistic_kernel(%arg0: i32, %arg1: i32, %arg2: memref<2x256xf32, #tpu.memory_space<vmem>>, %arg3: memref<2x2x256xf32, #tpu.memory_space<vmem>>, %arg4: memref<2x1xf32, #tpu.memory_space<vmem>>, %arg5: memref<2x256xf32, #tpu.memory_space<vmem>>) attributes {dimension_semantics = [#tpu.dimension_semantics<parallel>, #tpu.dimension_semantics<arbitrary>], iteration_bounds = array<i64: 1, 1>, scalar_prefetch = 0 : i64, scratch_operands = 1 : i64, tpu.core_type = #tpu.core_type<tc>, window_params = [{transform_indices = @transform_0, window_bounds = array<i64: 2, 256>}, {transform_indices = @transform_1, window_bounds = array<i64: 2, 2, 256>}, {transform_indices = @transform_2, window_bounds = array<i64: 2, 1>}]} {
    %c0_i32 = arith.constant 0 : i32
    %0 = arith.cmpi eq, %arg1, %c0_i32 : i32
    %1 = arith.extui %0 : i1 to i32
    %c0_i32_0 = arith.constant 0 : i32
    %2 = arith.cmpi ne, %1, %c0_i32_0 : i32
    scf.if %2 {
      %cst_25 = arith.constant 0.000000e+00 : f32
      %59 = vector.broadcast %cst_25 : f32 to vector<2x256xf32>
      %c0_26 = arith.constant 0 : index
      %c0_27 = arith.constant 0 : index
      %60 = vector.load %arg5[%c0_26, %c0_27] : memref<2x256xf32, #tpu.memory_space<vmem>>, vector<2x256xf32>
      tpu.vector_store %arg5[%c0_26, %c0_27], %59 {strides = array<i32>} : memref<2x256xf32, #tpu.memory_space<vmem>>, vector<2x256xf32>,
    } else {
    }
    %c0 = arith.constant 0 : index
    %c0_1 = arith.constant 0 : index
    %3 = vector.load %arg2[%c0, %c0_1] : memref<2x256xf32, #tpu.memory_space<vmem>>, vector<2x256xf32>
    %c0_2 = arith.constant 0 : index
    %c0_3 = arith.constant 0 : index
    %c0_4 = arith.constant 0 : index
    %4 = vector.load %arg3[%c0_2, %c0_3, %c0_4] : memref<2x2x256xf32, #tpu.memory_space<vmem>>, vector<1x2x256xf32>
    %5 = vector.shape_cast %4 : vector<1x2x256xf32> to vector<2x256xf32>
    %c1 = arith.constant 1 : index
    %c0_5 = arith.constant 0 : index
    %c0_6 = arith.constant 0 : index
    %6 = vector.load %arg3[%c1, %c0_5, %c0_6] : memref<2x2x256xf32, #tpu.memory_space<vmem>>, vector<1x2x256xf32>
    %7 = vector.shape_cast %6 : vector<1x2x256xf32> to vector<2x256xf32>
    %cst = arith.constant 8.000000e+01 : f32
    %8 = vector.broadcast %cst : f32 to vector<2x256xf32>
    %9 = arith.minimumf %7, %8 : vector<2x256xf32>
    %cst_7 = arith.constant 0.000000e+00 : f32
    %10 = vector.broadcast %cst_7 : f32 to vector<2x256xf32>
    %11 = arith.subf %10, %9 : vector<2x256xf32>
    %12 = math.exp %11 : vector<2x256xf32>
    %cst_8 = arith.constant 1.000000e+07 : f32
    %13 = vector.broadcast %cst_8 : f32 to vector<2x256xf32>
    %14 = arith.minimumf %12, %13 : vector<2x256xf32>
    %15 = arith.subf %3, %5 : vector<2x256xf32>
    %cst_9 = arith.constant 0.001953125 : f32
    %16 = vector.broadcast %cst_9 : f32 to vector<2x256xf32>
    %17 = arith.addf %15, %16 : vector<2x256xf32>
    %18 = arith.mulf %17, %14 : vector<2x256xf32>
    %19 = arith.negf %18 : vector<2x256xf32>
    %20 = math.exp %19 : vector<2x256xf32>
    %cst_10 = arith.constant 1.000000e+00 : f32
    %21 = vector.broadcast %cst_10 : f32 to vector<2x256xf32>
    %22 = arith.addf %21, %20 : vector<2x256xf32>
    %23 = arith.divf %21, %22 : vector<2x256xf32>
    %cst_11 = arith.constant 0.001953125 : f32
    %24 = vector.broadcast %cst_11 : f32 to vector<2x256xf32>
    %25 = arith.subf %15, %24 : vector<2x256xf32>
    %26 = arith.mulf %25, %14 : vector<2x256xf32>
    %27 = arith.negf %26 : vector<2x256xf32>
    %28 = math.exp %27 : vector<2x256xf32>
    %cst_12 = arith.constant 1.000000e+00 : f32
    %29 = vector.broadcast %cst_12 : f32 to vector<2x256xf32>
    %30 = arith.addf %29, %28 : vector<2x256xf32>
    %31 = arith.divf %29, %30 : vector<2x256xf32>
    %cst_13 = arith.constant 0.9921875 : f32
    %32 = vector.broadcast %cst_13 : f32 to vector<2x256xf32>
    %33 = arith.cmpf ogt, %3, %32 : vector<2x256xf32>
    %34 = arith.extui %33 : vector<2x256xi1> to vector<2x256xi32>
    %35 = arith.sitofp %34 : vector<2x256xi32> to vector<2x256xf32>
    %cst_14 = arith.constant 1.000000e+00 : f32
    %36 = vector.broadcast %cst_14 : f32 to vector<2x256xf32>
    %37 = arith.subf %36, %35 : vector<2x256xf32>
    %38 = arith.mulf %23, %37 : vector<2x256xf32>
    %39 = arith.addf %38, %35 : vector<2x256xf32>
    %cst_15 = arith.constant 3.906250e-03 : f32
    %40 = vector.broadcast %cst_15 : f32 to vector<2x256xf32>
    %41 = arith.cmpf olt, %3, %40 : vector<2x256xf32>
    %42 = arith.extui %41 : vector<2x256xi1> to vector<2x256xi32>
    %43 = arith.sitofp %42 : vector<2x256xi32> to vector<2x256xf32>
    %cst_16 = arith.constant 1.000000e+00 : f32
    %44 = vector.broadcast %cst_16 : f32 to vector<2x256xf32>
    %45 = arith.subf %44, %43 : vector<2x256xf32>
    %46 = arith.mulf %31, %45 : vector<2x256xf32>
    %47 = arith.subf %39, %46 : vector<2x256xf32>
    %cst_17 = arith.constant 1.000000e-07 : f32
    %48 = vector.broadcast %cst_17 : f32 to vector<2x256xf32>
    %49 = arith.maximumf %47, %48 : vector<2x256xf32>
    %50 = math.log %49 : vector<2x256xf32>
    %cst_18 = arith.constant 0.000000e+00 : f32
    %51 = vector.broadcast %cst_18 : f32 to vector<2x256xf32>
    %52 = arith.subf %51, %50 : vector<2x256xf32>
    %c0_19 = arith.constant 0 : index
    %c0_20 = arith.constant 0 : index
    %53 = vector.load %arg5[%c0_19, %c0_20] : memref<2x256xf32, #tpu.memory_space<vmem>>, vector<2x256xf32>
    %54 = arith.addf %53, %52 : vector<2x256xf32>
    %c0_21 = arith.constant 0 : index
    %c0_22 = arith.constant 0 : index
    %55 = vector.load %arg5[%c0_21, %c0_22] : memref<2x256xf32, #tpu.memory_space<vmem>>, vector<2x256xf32>
    tpu.vector_store %arg5[%c0_21, %c0_22], %54 {strides = array<i32>} : memref<2x256xf32, #tpu.memory_space<vmem>>, vector<2x256xf32>,
    %c0_i32_23 = arith.constant 0 : i32
    %56 = arith.cmpi eq, %arg1, %c0_i32_23 : i32
    %57 = arith.extui %56 : i1 to i32
    %c0_i32_24 = arith.constant 0 : i32
    %58 = arith.cmpi ne, %57, %c0_i32_24 : i32
    scf.if %58 {
      %c0_25 = arith.constant 0 : index
      %c0_26 = arith.constant 0 : index
      %59 = vector.load %arg5[%c0_25, %c0_26] : memref<2x256xf32, #tpu.memory_space<vmem>>, vector<2x256xf32>
      %cst_27 = arith.constant dense<0.000000e+00> : vector<2xf32>
      %60 = vector.multi_reduction <add>, %59, %cst_27 [1] : vector<2x256xf32> to vector<2xf32>
      %61 = vector.shape_cast %60 : vector<2xf32> to vector<2x1xf32>
      %c0_28 = arith.constant 0 : index
      %c0_29 = arith.constant 0 : index
      %62 = vector.load %arg4[%c0_28, %c0_29] : memref<2x1xf32, #tpu.memory_space<vmem>>, vector<2x1xf32>
      tpu.vector_store %arg4[%c0_28, %c0_29], %61 {strides = array<i32>} : memref<2x1xf32, #tpu.memory_space<vmem>>, vector<2x1xf32>,
    } else {
    }
    return
  }
  func.func @transform_0(%arg0: i32, %arg1: i32) -> (i32, i32) {
    %c0_i32 = arith.constant 0 : i32
    return %arg0, %arg1 : i32, i32
  }
  func.func @transform_1(%arg0: i32, %arg1: i32) -> (i32, i32, i32) {
    %c0_i32 = arith.constant 0 : i32
    %c0_i32_0 = arith.constant 0 : i32
    return %c0_i32, %arg0, %arg1 : i32, i32, i32
  }
  func.func @transform_2(%arg0: i32, %arg1: i32) -> (i32, i32) {
    %c0_i32 = arith.constant 0 : i32
    %c0_i32_0 = arith.constant 0 : i32
    return %arg0, %c0_i32 : i32, i32
  }
}

</mosaic_0001>

<bundles_post_ra>
// kernel: tpu_custom_call.1
= control target key start
LH: loop header
LB: loop body
LE: loop exit
PB: predicated region body
PF: predicated region fallthrough
CT: control target
= control target key end

     0   :  { %7 = vsyncpa [#allocation4], 0  ;;  %s244_s0 = inlined_call_operand.hbm [shape: f32[2,256], index: 0, kind: input, shape index: {}]   ;;  %s245_s1 = inlined_call_operand.hbm [shape: f32[2,2,256], index: 1, kind: input, shape index: {}]   ;;  %s246_s2 = inlined_call_operand.vmem [shape: f32[2,1], index: 2, kind: output, shape index: {}]  }
   0x1   :  { %s14_s11 = sshll.u32 %s244_s0, 4  ;;  %s15_s11 = int_to_ptr.hbm [resolvable:$true] %s14_s11 }
   0x2   :  { %8 = vsyncpa [#allocation6], 0  ;;  %s215_s12 = smov [#allocation3]   ;;  %s24_s16 = sshll.u32 %s245_s1, 4  ;;  %s25_s16 = int_to_ptr.hbm [resolvable:$true] %s24_s16 }
   0x3   :  { %s16_s13 = sshll.u32 %s215_s12, 4  ;;  %s216_s17 = smov [#allocation5]   ;;  %s17_s13 = int_to_ptr.vmem [resolvable:$true] %s16_s13 }
   0x4   :  { %19 = dma.hbm_to_vmem [thread:$0]  %s15_s11, 64, %s17_s13, [#allocation4]  }
   0x5   :  { %s26_s18 = sshll.u32 %s216_s17, 4  ;;  %s217_s19 = smov 64   ;;  %s27_s18 = int_to_ptr.vmem [resolvable:$true] %s26_s18 }
   0x6   :  { %s218_s20 = smov 4  }
   0x7   :  { %32 = dma.hbm_to_vmem [thread:$0]  %s25_s16, 128, %s27_s18, [#allocation6], %s217_s19, %s217_s19, %s218_s20  }
   0x8   :  { %211 = dma.done.wait [#allocation4], 64  }
   0x9   :  { %212 = vsyncadd [#allocation4], 4294967232 }
   0xa   :  { %213 = dma.done.wait [#allocation6], 128  }
   0xb   :  { %214 = vsyncadd [#allocation6], 4294967168  ;;  %v219_v0 = vmov 0.0   ;;  %v49_v1 = vld [vmem:[#allocation5 + $0x4] sm:$0xf]  ;;  %vm127_vm10 = vcmask 1041408  }
   0xc   :  { %45 = vst [vmem:[#allocation2] sm:$0xf] %v219_v0  ;;  %v50_v2 = vmin.f32 %v49_v1, 80.0  ;;  %v46_v4 = vld [vmem:[#allocation3] sm:$0xf]  ;;  %vm133_vm11 = vcmask 1024  }
   0xd   :  { %v47_v5 = vld [vmem:[#allocation5] sm:$0xf]  ;;  %vm98_vm0 = vcmp.gt.f32.partialorder %v46_v4, 0.9921875  ;;  %vm104_vm2 = vcmp.lt.f32.partialorder %v46_v4, 0.00390625 }
   0xe   :  { %v51_v3 = vsub.f32 0.0, %v50_v2  ;;  %v55_v7 = vsub.f32 %v46_v4, %v47_v5  ;;  %v144_v23 = vsel %vm98_vm0, 1.0, %v219_v0  ;;  %v145_v32 = vsel %vm104_vm2, 1.0, %v219_v0 }
   0xf   :  { %v101_v37 = vsub.f32 1.0, %v144_v23  ;;  %v107_v39 = vsub.f32 1.0, %v145_v32 }
  0x10   :  { %v52_v6 = vmul.f32 1.442695, %v51_v3  ;;  %v56_v8 = vadd.f32 0.001953125, %v55_v7  ;;  %v142_v9 = vadd.f32 -0.001953125, %v55_v7 }
  0x12   :  { %151 = vpow2.f32 %v52_v6 }
  0x13   :  { %v114_v51 = vld [vmem:[#allocation2] sm:$0xf] }
  0x18   :  { %v152_v10 = vpop.eup %151 }
  0x19   :  { %v54_v11 = vmin.f32 %v152_v10, 10000000.0 }
  0x1b   :  { %v57_v12 = vmul.f32 %v56_v8, %v54_v11  ;;  %v78_v13 = vmul.f32 %v142_v9, %v54_v11 }
  0x1d   :  { %v141_v14 = vmul.f32 -1.442695, %v57_v12  ;;  %v143_v15 = vmul.f32 -1.442695, %v78_v13 }
  0x1f   :  { %153 = vpow2.f32 %v141_v14 }
  0x20   :  { %155 = vpow2.f32 %v143_v15 }
  0x25   :  { %v154_v16 = vpop.eup %153 }
  0x26   :  { %v156_v17 = vpop.eup %155  ;;  %v61_v18 = vadd.f32 1.0, %v154_v16 }
  0x27   :  { %v82_v19 = vadd.f32 1.0, %v156_v17 }
  0x28   :  { %157 = vrcp.f32 %v61_v18  ;;  %vm67_vm1 = vweird.f32 %v61_v18  ;;  %v73_v24 = vand.u32 2147483648, %v61_v18  ;;  %v71_v27 = vand.u32 2147483647, %v61_v18 }
  0x29   :  { %159 = vrcp.f32 %v82_v19  ;;  %v94_v28 = vand.u32 2147483648, %v82_v19  ;;  %vm88_vm4 = vweird.f32 %v82_v19  ;;  %v92_v30 = vand.u32 2147483647, %v82_v19 }
  0x2a   :  { %v74_v33 = vor.u32 1.1754944e-38, %v73_v24  ;;  %vm72_vm7 = vcmp.eq.f32.partialorder %v71_v27, 8.507059e+37 }
  0x2b   :  { %v95_v36 = vor.u32 1.1754944e-38, %v94_v28  ;;  %vm93_vm9 = vcmp.eq.f32.partialorder %v92_v30, 8.507059e+37 }
  0x2e   :  { %v158_v20 = vpop.eup %157 }
  0x2f   :  { %v160_v21 = vpop.eup %159  ;;  %v63_v22 = vmul.f32 %v158_v20, %v61_v18  ;;  %vm68_vm3 = vweird.f32 %v158_v20 }
  0x30   :  { %v84_v25 = vmul.f32 %v160_v21, %v82_v19  ;;  %vm89_vm5 = vweird.f32 %v160_v21  ;;  %vm69_vm6 = vmor %vm67_vm1, %vm68_vm3 }
  0x31   :  { %v64_v26 = vsub.f32 1.0, %v63_v22  ;;  %vm90_vm8 = vmor %vm88_vm4, %vm89_vm5 }
  0x32   :  { %v85_v29 = vsub.f32 1.0, %v84_v25 }
  0x33   :  { %v65_v31 = vmul.f32 %v158_v20, %v64_v26 }
  0x34   :  { %v86_v34 = vmul.f32 %v160_v21, %v85_v29 }
  0x35   :  { %v66_v35 = vadd.f32 %v158_v20, %v65_v31 }
  0x36   :  { %v87_v38 = vadd.f32 %v160_v21, %v86_v34 }
  0x37   :  { %v70_v40 = vsel %vm69_vm6, %v158_v20, %v66_v35 }
  0x38   :  { %v75_v41 = vsel %vm72_vm7, %v74_v33, %v70_v40  ;;  %v91_v42 = vsel %vm90_vm8, %v160_v21, %v87_v38 }
  0x39   :  { %v96_v43 = vsel %vm93_vm9, %v95_v36, %v91_v42  ;;  %v102_v44 = vmul.f32 %v101_v37, %v75_v41 }
  0x3a   :  { %v108_v45 = vmul.f32 %v107_v39, %v96_v43 }
  0x3b   :  { %v103_v46 = vadd.f32 %v144_v23, %v102_v44 }
  0x3d   :  { %v109_v47 = vsub.f32 %v103_v46, %v108_v45 }
  0x3f   :  { %v110_v48 = vmax.f32 %v109_v47, 1e-07 }
  0x41   :  { %161 = vlog2.f32 %v110_v48 }
  0x47   :  { %v162_v49 = vpop.eup %161 }
  0x48   :  { %v112_v50 = vmul.f32 0.6931472, %v162_v49 }
  0x4a   :  { %v113_v52 = vsub.f32 0.0, %v112_v50 }
  0x4c   :  { %v115_v53 = vadd.f32 %v114_v51, %v113_v52 }
  0x4e   :  { %116 = vst [vmem:[#allocation2] sm:$0xf] %v115_v53 }
  0x55   :  { %v120_v54 = vld [vmem:[#allocation2] sm:$0xf] }
  0x56   :  { %122 = vst [vmem:[#allocation1] ss:$4 sm:$0xff] %v120_v54 }
  0x5d   :  { %v123_v55 = vld.sshfl [vmem:[#allocation1] sm:$0xff pattern:$0x73625140]  ;;  %v124_v56 = vld.sshfl [vmem:[#allocation1 + $0x8] sm:$0xff pattern:$0x73625140] }
  0x5e   :  { %v128_v57 = vsel %vm127_vm10, %v123_v55, 0.0  ;;  %v129_v58 = vsel %vm127_vm10, %v124_v56, 0.0 }
  0x5f   :  { %v130_v59 = vadd.f32 %v129_v58, %v128_v57 }
  0x61   :  { %131 = vadd.xlane.f32.xlu0 %v130_v59 }
  0xd4   :  { %v132_v60 = vpop.xlane.xlu0 %131 }
  0xd5   :  { %134 = vst.msk [vmem:[%s246_s2] sm:$0x3] %vm133_vm11, %v132_v60 }
  0xd6   :  { %139 = vsyncpa [#allocation4], 1 }
  0xd7   :  { %140 = vsyncpa [#allocation6], 1 }

</bundles_post_ra>
